<compile_context>
chip_gen: v5e
topology: v5e:2x2
jax: 0.10.0
libtpu: 0.0.40
codegen_flags: <defaults>
</compile_context>

<pallas_src>
import jax
import jax.numpy as jnp
from jax.experimental import pallas as pl
from jax.experimental.pallas import tpu as pltpu

_SOBEL_X = ((-1.0, 0.0, 1.0), (-2.0, 0.0, 2.0), (-1.0, 0.0, 1.0))
_SOBEL_Y = ((-1.0, -2.0, -1.0), (0.0, 0.0, 0.0), (1.0, 2.0, 1.0))


def _round_up(x, m):
    return (x + m - 1) // m * m


# ---------------------------------------------------------------------------
# Pallas kernel
# ---------------------------------------------------------------------------
def _sobel_kernel(x_ref, o_ref, acc_ref):
    """x_ref:   (1, TC, Hp+2, Wp+2) zero-padded input channel chunk (NCHW).
    o_ref:   (1, 2, Hp, Wp) output block (resident across the channel axis).
    acc_ref: (Hp+2, Wp+2) f32 scratch holding the running channel sum."""
    cb = pl.program_id(1)

    @pl.when(cb == 0)
    def _():
        acc_ref[...] = jnp.zeros_like(acc_ref)

    # The Sobel filters are repeated across input channels, so the conv is
    # exactly a 3x3 stencil applied to the channel sum.
    acc_ref[...] += jnp.sum(x_ref[0], axis=0)

    @pl.when(cb == pl.num_programs(1) - 1)
    def _():
        hp = o_ref.shape[2]
        wp = o_ref.shape[3]
        xs = acc_ref[...]                       # (Hp+2, Wp+2)
        gx = jnp.zeros((hp, wp), jnp.float32)
        gy = jnp.zeros((hp, wp), jnp.float32)
        for di in range(3):                     # static 3x3 tap loop (VPU)
            for dj in range(3):
                win = xs[di:di + hp, dj:dj + wp]
                cx = _SOBEL_X[di][dj]
                cy = _SOBEL_Y[di][dj]
                if cx != 0.0:
                    gx = gx + cx * win
                if cy != 0.0:
                    gy = gy + cy * win
        o_ref[0, 0, :, :] = gx
        o_ref[0, 1, :, :] = gy


# ---------------------------------------------------------------------------
# Wrapper (NCHW in -> NCHW out, matching nn.Conv2d(inC, 2, 3, 1, 1, bias=False))
# ---------------------------------------------------------------------------
@jax.jit
def sobel_forward(img):
    """img: (N, C, H, W) f32 -> (N, 2, H, W) f32 Sobel-X / Sobel-Y responses."""
    n, c, h, w = img.shape
    hp = _round_up(h, 8)
    wp = _round_up(w, 128)                      # lane-dense output width

    # Channel-chunk size: keep one (TC, Hp+2, Wp+2) f32 slab small enough to
    # double-buffer comfortably in VMEM on all TPU generations (incl. v7x).
    slab_bytes = (hp + 2) * (wp + 2) * 4
    tc = max(1, min(c, (4 << 20) // max(slab_bytes, 1)))
    cp = _round_up(c, tc)
    grid_c = cp // tc

    # Zero padding supplies both the conv halo (padding=1) and the tile
    # padding; the extra rows/cols only affect output positions we slice off,
    # and the extra zero channels contribute nothing to the channel sum.
    xp = jnp.pad(img, ((0, 0), (0, cp - c), (1, hp - h + 1), (1, wp - w + 1)))

    out = pl.pallas_call(
        _sobel_kernel,
        out_shape=jax.ShapeDtypeStruct((n, 2, hp, wp), jnp.float32),
        grid=(n, grid_c),
        in_specs=[pl.BlockSpec((1, tc, hp + 2, wp + 2),
                               lambda i, cb: (i, cb, 0, 0))],
        out_specs=pl.BlockSpec((1, 2, hp, wp), lambda i, cb: (i, 0, 0, 0)),
        scratch_shapes=[pltpu.VMEM((hp + 2, wp + 2), jnp.float32)],
        compiler_params=pltpu.CompilerParams(
            dimension_semantics=("parallel", "arbitrary")),
    )(xp)
    # TODO(synk): for very large H*W (e.g. 4K images) add halo row-tiling so
    #             the per-block spatial slab stays bounded instead of (Hp+2, Wp+2).
    return out[:, :, :h, :w]


# ---------------------------------------------------------------------------
# Pure-JAX reference (for correctness check only)
# ---------------------------------------------------------------------------
def sobel_reference(img):
    c = img.shape[1]
    sx = jnp.array(_SOBEL_X, jnp.float32)
    sy = jnp.array(_SOBEL_Y, jnp.float32)
    w = jnp.stack([jnp.broadcast_to(sx, (c, 3, 3)),
                   jnp.broadcast_to(sy, (c, 3, 3))], axis=0)   # OIHW (2,C,3,3)
    return jax.lax.conv_general_dilated(
        img, w, window_strides=(1, 1), padding=((1, 1), (1, 1)),
        dimension_numbers=("NCHW", "OIHW", "NCHW"))


if __name__ == "__main__":
    inchannels = 4
    x = jax.random.normal(jax.random.PRNGKey(0), (2, inchannels, 16, 16),
                          jnp.float32)

    out = sobel_forward(x)
    out = jax.block_until_ready(out)

    assert out.shape == (2, 2, 16, 16), out.shape
    assert bool(jnp.isfinite(out).all())

    ref = sobel_reference(x)
    max_err = float(jnp.max(jnp.abs(out - ref)))
    assert bool(jnp.allclose(out, ref, atol=1e-3, rtol=1e-3)), max_err

    print("KERNEL_OK")
</pallas_src>

<mosaic_0001>
module attributes {stable_mosaic.version = 11 : i64} {
  func.func @_sobel_kernel(%arg0: i32, %arg1: i32, %arg2: memref<1x4x18x130xf32, #tpu.memory_space<vmem>>, %arg3: memref<1x2x16x128xf32, #tpu.memory_space<vmem>>, %arg4: memref<18x130xf32, #tpu.memory_space<vmem>>) attributes {dimension_semantics = [#tpu.dimension_semantics<parallel>, #tpu.dimension_semantics<arbitrary>], iteration_bounds = array<i64: 2, 1>, scalar_prefetch = 0 : i64, scratch_operands = 1 : i64, tpu.core_type = #tpu.core_type<tc>, window_params = [{transform_indices = @transform_0, window_bounds = array<i64: 1, 4, 18, 130>}, {transform_indices = @transform_1, window_bounds = array<i64: 1, 2, 16, 128>}]} {
    %c0_i32 = arith.constant 0 : i32
    %0 = arith.cmpi eq, %arg1, %c0_i32 : i32
    %1 = arith.extui %0 : i1 to i32
    %c0_i32_0 = arith.constant 0 : i32
    %2 = arith.cmpi ne, %1, %c0_i32_0 : i32
    scf.if %2 {
      %cst_10 = arith.constant 0.000000e+00 : f32
      %12 = vector.broadcast %cst_10 : f32 to vector<18x130xf32>
      %c0_11 = arith.constant 0 : index
      %c0_12 = arith.constant 0 : index
      %13 = vector.load %arg4[%c0_11, %c0_12] : memref<18x130xf32, #tpu.memory_space<vmem>>, vector<18x130xf32>
      tpu.vector_store %arg4[%c0_11, %c0_12], %12 {strides = array<i32>} : memref<18x130xf32, #tpu.memory_space<vmem>>, vector<18x130xf32>,
    } else {
    }
    %c0 = arith.constant 0 : index
    %c0_1 = arith.constant 0 : index
    %3 = vector.load %arg4[%c0, %c0_1] : memref<18x130xf32, #tpu.memory_space<vmem>>, vector<18x130xf32>
    %c0_2 = arith.constant 0 : index
    %c0_3 = arith.constant 0 : index
    %c0_4 = arith.constant 0 : index
    %c0_5 = arith.constant 0 : index
    %4 = vector.load %arg2[%c0_2, %c0_3, %c0_4, %c0_5] : memref<1x4x18x130xf32, #tpu.memory_space<vmem>>, vector<1x4x18x130xf32>
    %5 = vector.shape_cast %4 : vector<1x4x18x130xf32> to vector<4x18x130xf32>
    %cst = arith.constant dense<0.000000e+00> : vector<18x130xf32>
    %6 = vector.multi_reduction <add>, %5, %cst [0] : vector<4x18x130xf32> to vector<18x130xf32>
    %7 = arith.addf %3, %6 : vector<18x130xf32>
    %c0_6 = arith.constant 0 : index
    %c0_7 = arith.constant 0 : index
    %8 = vector.load %arg4[%c0_6, %c0_7] : memref<18x130xf32, #tpu.memory_space<vmem>>, vector<18x130xf32>
    tpu.vector_store %arg4[%c0_6, %c0_7], %7 {strides = array<i32>} : memref<18x130xf32, #tpu.memory_space<vmem>>, vector<18x130xf32>,
    %c0_i32_8 = arith.constant 0 : i32
    %9 = arith.cmpi eq, %arg1, %c0_i32_8 : i32
    %10 = arith.extui %9 : i1 to i32
    %c0_i32_9 = arith.constant 0 : i32
    %11 = arith.cmpi ne, %10, %c0_i32_9 : i32
    scf.if %11 {
      %c0_10 = arith.constant 0 : index
      %c0_11 = arith.constant 0 : index
      %12 = vector.load %arg4[%c0_10, %c0_11] : memref<18x130xf32, #tpu.memory_space<vmem>>, vector<18x130xf32>
      %cst_12 = arith.constant 0.000000e+00 : f32
      %13 = vector.broadcast %cst_12 : f32 to vector<16x128xf32>
      %cst_13 = arith.constant 0.000000e+00 : f32
      %14 = vector.broadcast %cst_13 : f32 to vector<16x128xf32>
      %15 = vector.extract_strided_slice %12 {offsets = [0, 0], sizes = [16, 128], strides = [1, 1]} : vector<18x130xf32> to vector<16x128xf32>
      %cst_14 = arith.constant -1.000000e+00 : f32
      %16 = vector.broadcast %cst_14 : f32 to vector<16x128xf32>
      %17 = arith.mulf %16, %15 : vector<16x128xf32>
      %18 = arith.addf %13, %17 : vector<16x128xf32>
      %cst_15 = arith.constant -1.000000e+00 : f32
      %19 = vector.broadcast %cst_15 : f32 to vector<16x128xf32>
      %20 = arith.mulf %19, %15 : vector<16x128xf32>
      %21 = arith.addf %14, %20 : vector<16x128xf32>
      %22 = vector.extract_strided_slice %12 {offsets = [0, 1], sizes = [16, 128], strides = [1, 1]} : vector<18x130xf32> to vector<16x128xf32>
      %cst_16 = arith.constant -2.000000e+00 : f32
      %23 = vector.broadcast %cst_16 : f32 to vector<16x128xf32>
      %24 = arith.mulf %23, %22 : vector<16x128xf32>
      %25 = arith.addf %21, %24 : vector<16x128xf32>
      %26 = vector.extract_strided_slice %12 {offsets = [0, 2], sizes = [16, 128], strides = [1, 1]} : vector<18x130xf32> to vector<16x128xf32>
      %cst_17 = arith.constant 1.000000e+00 : f32
      %27 = vector.broadcast %cst_17 : f32 to vector<16x128xf32>
      %28 = arith.mulf %27, %26 : vector<16x128xf32>
      %29 = arith.addf %18, %28 : vector<16x128xf32>
      %cst_18 = arith.constant -1.000000e+00 : f32
      %30 = vector.broadcast %cst_18 : f32 to vector<16x128xf32>
      %31 = arith.mulf %30, %26 : vector<16x128xf32>
      %32 = arith.addf %25, %31 : vector<16x128xf32>
      %33 = vector.extract_strided_slice %12 {offsets = [1, 0], sizes = [16, 128], strides = [1, 1]} : vector<18x130xf32> to vector<16x128xf32>
      %cst_19 = arith.constant -2.000000e+00 : f32
      %34 = vector.broadcast %cst_19 : f32 to vector<16x128xf32>
      %35 = arith.mulf %34, %33 : vector<16x128xf32>
      %36 = arith.addf %29, %35 : vector<16x128xf32>
      %37 = vector.extract_strided_slice %12 {offsets = [1, 2], sizes = [16, 128], strides = [1, 1]} : vector<18x130xf32> to vector<16x128xf32>
      %cst_20 = arith.constant 2.000000e+00 : f32
      %38 = vector.broadcast %cst_20 : f32 to vector<16x128xf32>
      %39 = arith.mulf %38, %37 : vector<16x128xf32>
      %40 = arith.addf %36, %39 : vector<16x128xf32>
      %41 = vector.extract_strided_slice %12 {offsets = [2, 0], sizes = [16, 128], strides = [1, 1]} : vector<18x130xf32> to vector<16x128xf32>
      %cst_21 = arith.constant -1.000000e+00 : f32
      %42 = vector.broadcast %cst_21 : f32 to vector<16x128xf32>
      %43 = arith.mulf %42, %41 : vector<16x128xf32>
      %44 = arith.addf %40, %43 : vector<16x128xf32>
      %cst_22 = arith.constant 1.000000e+00 : f32
      %45 = vector.broadcast %cst_22 : f32 to vector<16x128xf32>
      %46 = arith.mulf %45, %41 : vector<16x128xf32>
      %47 = arith.addf %32, %46 : vector<16x128xf32>
      %48 = vector.extract_strided_slice %12 {offsets = [2, 1], sizes = [16, 128], strides = [1, 1]} : vector<18x130xf32> to vector<16x128xf32>
      %cst_23 = arith.constant 2.000000e+00 : f32
      %49 = vector.broadcast %cst_23 : f32 to vector<16x128xf32>
      %50 = arith.mulf %49, %48 : vector<16x128xf32>
      %51 = arith.addf %47, %50 : vector<16x128xf32>
      %52 = vector.extract_strided_slice %12 {offsets = [2, 2], sizes = [16, 128], strides = [1, 1]} : vector<18x130xf32> to vector<16x128xf32>
      %cst_24 = arith.constant 1.000000e+00 : f32
      %53 = vector.broadcast %cst_24 : f32 to vector<16x128xf32>
      %54 = arith.mulf %53, %52 : vector<16x128xf32>
      %55 = arith.addf %44, %54 : vector<16x128xf32>
      %cst_25 = arith.constant 1.000000e+00 : f32
      %56 = vector.broadcast %cst_25 : f32 to vector<16x128xf32>
      %57 = arith.mulf %56, %52 : vector<16x128xf32>
      %58 = arith.addf %51, %57 : vector<16x128xf32>
      %c0_26 = arith.constant 0 : index
      %c0_27 = arith.constant 0 : index
      %c0_28 = arith.constant 0 : index
      %c0_29 = arith.constant 0 : index
      %59 = vector.load %arg3[%c0_26, %c0_27, %c0_28, %c0_29] : memref<1x2x16x128xf32, #tpu.memory_space<vmem>>, vector<1x1x16x128xf32>
      %60 = vector.shape_cast %59 : vector<1x1x16x128xf32> to vector<16x128xf32>
      %61 = vector.shape_cast %55 : vector<16x128xf32> to vector<1x1x16x128xf32>
      tpu.vector_store %arg3[%c0_26, %c0_27, %c0_28, %c0_29], %61 {strides = array<i32>} : memref<1x2x16x128xf32, #tpu.memory_space<vmem>>, vector<1x1x16x128xf32>,
      %c0_30 = arith.constant 0 : index
      %c1 = arith.constant 1 : index
      %c0_31 = arith.constant 0 : index
      %c0_32 = arith.constant 0 : index
      %62 = vector.load %arg3[%c0_30, %c1, %c0_31, %c0_32] : memref<1x2x16x128xf32, #tpu.memory_space<vmem>>, vector<1x1x16x128xf32>
      %63 = vector.shape_cast %62 : vector<1x1x16x128xf32> to vector<16x128xf32>
      %64 = vector.shape_cast %58 : vector<16x128xf32> to vector<1x1x16x128xf32>
      tpu.vector_store %arg3[%c0_30, %c1, %c0_31, %c0_32], %64 {strides = array<i32>} : memref<1x2x16x128xf32, #tpu.memory_space<vmem>>, vector<1x1x16x128xf32>,
    } else {
    }
    return
  }
  func.func @transform_0(%arg0: i32, %arg1: i32) -> (i32, i32, i32, i32) {
    %c0_i32 = arith.constant 0 : i32
    %c0_i32_0 = arith.constant 0 : i32
    %c0_i32_1 = arith.constant 0 : i32
    return %arg0, %arg1, %c0_i32, %c0_i32_0 : i32, i32, i32, i32
  }
  func.func @transform_1(%arg0: i32, %arg1: i32) -> (i32, i32, i32, i32) {
    %c0_i32 = arith.constant 0 : i32
    %c0_i32_0 = arith.constant 0 : i32
    %c0_i32_1 = arith.constant 0 : i32
    %c0_i32_2 = arith.constant 0 : i32
    return %arg0, %c0_i32, %c0_i32_0, %c0_i32_1 : i32, i32, i32, i32
  }
}

</mosaic_0001>

<bundles_post_ra>
// kernel: sobel_forward.1
= control target key start
LH: loop header
LB: loop body
LE: loop exit
PB: predicated region body
PF: predicated region fallthrough
CT: control target
= control target key end

     0   :  { %6 = vsyncpa [#allocation4], 0  ;;  %s951_s0 = inlined_call_operand.vmem [shape: f32[2,4,18,130], index: 0, kind: input, shape index: {}]   ;;  %s952_s1 = inlined_call_operand.hbm [shape: f32[2,2,16,128], index: 1, kind: output, shape index: {}]  }
   0x1   :  { %8 = vsyncpa [#allocation4 + $0x1], 0  ;;  %s699_s6 = smov 0   ;;  %s701_s7 = smov 0  }
   0x2   :  { %s703_s8 = smov 0   ;;  %s705_s9 = smov 0  }
   0x3   :  { %s707_s10 = smov 0   ;;  %s709_s11 = smov 0  }
   0x4 LB: > { %s528_s12 = sadd.s32 4294967295, %s682_s11   ;;  %s529_s13 = sadd.s32 4294967294, %s682_s11   ;;  %s682_s11 = sphi %s709_s11, %s14_s11   ;;  %s678_s10 = sphi %s707_s10, %s959_s10   ;;  %s674_s9 = sphi %s705_s9, %s958_s9   ;;  %s670_s8 = sphi %s703_s8, %s957_s8   ;;  %s666_s7 = sphi %s701_s7, %s956_s7   ;;  %s662_s6 = sphi %s699_s6, %s955_s6  }
   0x5   : > { %s26_s14 = sadd.s32 1, %s678_s10  ;;  %s61_s15 = sadd.s32 1, %s670_s8 }
   0x6   : > { %p28_p0 = scmp.ge.s32.totalorder %s26_s14, 2  ;;  %p71_p1 = scmp.ne.s32.totalorder %s670_s8, %s666_s7 }
   0x7   : > { %p72_p2 = scmp.eq.s32.totalorder %s528_s12, 1  ;;  %p77_p3 = scmp.ne.s32.totalorder %s666_s7, %s662_s6 }
   0x8   : > { %s961_s14 = smov (%p28_p0, %s26_s14), 0  ;;  %p78_p5 = scmp.eq.s32.totalorder %s529_s13, 1 }
   0x9   : > { %p739_p4 = por %p72_p2, %p71_p1  ;;  %s58_s17 = ssub.s32 %s678_s10, %s961_s14 }
   0xa   : > { %p532_p6 = scmp.ge.s32.totalorder %s682_s11, 1  ;;  %p59_p7 = scmp.eq.s32.totalorder %s58_s17, 0 }
   0xb   : > { %p746_p8 = por %p78_p5, %p77_p3  ;;  %p110_p9 = scmp.lt.s32.totalorder %s682_s11, 3 }
   0xc   : > { %s752_s19 = scalar_select %p59_p7, %s670_s8, %s61_s15  }
   0xd   : > { %p111_p10 = pnand %p532_p6, %p110_p9 }
   0xe   : > { %p136_p11 = scmp.lt.s32.totalorder (!%p111_p10), %s674_s9, 1  ;;  %s685_s25 = smov (!%p111_p10), 126  }
   0xf   : > { %114 = sbr.rel (%p111_p10) target bundleno = 223 (0xdf), region = 24  ;;  %s686_s26 = smov (!%p111_p10), 127  }
  0x10   : > { %s132_s27 = sand.u32 (!%p111_p10), 1, %s666_s7   ;;  %s542_s29 = sshll.u32 (!%p111_p10), %s674_s9, 5 }
  0x11   : > { %s533_s28 = sshll.u32 (!%p111_p10), %s132_s27, 5  ;;  %s445_s4 = scalar_lea.hbm (!%p111_p10), %s952_s1, %s542_s29 }
  0x12   : > { %s134_s30 = scalar_lea.vmem (!%p111_p10), [#allocation3], %s533_s28  ;;  %s434_s12 = scalar_lea.sflag (!%p111_p10), [#allocation4], %s132_s27 }
  0x13   : > { %s446_s5 = sshll.u32 (!%p111_p10), %s134_s30, 4  ;;  %s447_s5 = int_to_ptr.vmem [resolvable:$true] %s446_s5 }
  0x14   : > { %vm151_vm0 = vcmask 15360   ;;  %v684_v0 = vmov 0.0   ;;  %vm156_vm1 = vcmask 9216   ;;  %s137_s20 = scalar_select %p136_p11, %s674_s9, 1  ;;  %vm209_vm2 = vcmask 1041408  }
  0x15   : > { %155 = vst [vmem:[#allocation2 + $0x20] sm:$0x3] %v684_v0  ;;  %vm314_vm3 = vcmask 1046528   ;;  %vm362_vm4 = vcmask 1045504   ;;  %vm285_vm5 = vcmask 1031168   ;;  %vm266_vm6 = vcmask 1039360  }
  0x16   : > { %154 = vst.msk [vmem:[#allocation2 + $0x18] sm:$0xff] %vm151_vm0, %v684_v0  ;;  %s543_s21 = smul.u32 192, %s137_s20  ;;  %s448_s9 = sshll.u32 %s445_s4, 4  ;;  %s449_s9 = int_to_ptr.hbm [resolvable:$true] %s448_s9 }
  0x17   : > { %152 = vst.msk [vmem:[#allocation2 + $0x8] sm:$0xff] %vm151_vm0, %v684_v0  ;;  %s618_s13 = sshra.s32 %s449_s9, 4  ;;  %s619_s13 = int_to_ptr.hbm [resolvable:$true] %s618_s13 }
  0x18   : > { %157 = vst.msk [vmem:[#allocation2 + $0x28] sm:$0x3] %vm156_vm1, %v684_v0  ;;  %s762_s24 = scalar_lea.vmem %s951_s0, %s543_s21  ;;  %s620_s15 = scalar_lea.hbm %s619_s13, 32 }
  0x19   : > { %v166_v1 = vld [vmem:[%s762_s24 + $0x10] sm:$0xff]  ;;  %v172_v2 = vld [vmem:[%s762_s24 + $0x40] sm:$0xff]  ;;  %v167_v5 = vld [vmem:[%s762_s24 + $0x18] sm:$0xff]  ;;  %p621_p12 = scmp.ne.s32.totalorder %s619_s13, %s620_s15  ;;  %s624_s21 = scalar_lea.hbm %s952_s1, 64 }
  0x1a   : > { %v178_v3 = vld [vmem:[%s762_s24 + $0x70] sm:$0xff]  ;;  %v199_v4 = vadd.f32 %v172_v2, %v166_v1  ;;  %v173_v6 = vld [vmem:[%s762_s24 + $0x48] sm:$0xff]  ;;  %v184_v7 = vld [vmem:[%s762_s24 + $0xa0] sm:$0xff]  ;;  %v202_v10 = vsel %vm151_vm0, %v167_v5, 0.0  ;;  %p625_p1 = scmp.lt.s32.totalorder %s619_s13, %s952_s1  ;;  %p626_p2 = scmp.lt.s32.totalorder %s624_s21, %s620_s15 }
  0x1b   : > { %v179_v8 = vld [vmem:[%s762_s24 + $0x78] sm:$0xff]  ;;  %v185_v9 = vld [vmem:[%s762_s24 + $0xa8] sm:$0xff]  ;;  %v203_v11 = vsel %vm151_vm0, %v173_v6, 0.0  ;;  %v164_v15 = vld [vmem:[%s762_s24] sm:$0xff]  ;;  %p622_p13 = pnand %p621_p12, %p739_p4 }
  0x1c   : > { %v200_v12 = vadd.f32 %v199_v4, %v178_v3  ;;  %v204_v13 = vadd.f32 %v203_v11, %v202_v10  ;;  %v205_v14 = vsel %vm151_vm0, %v179_v8, 0.0  ;;  %v170_v16 = vld [vmem:[%s762_s24 + $0x30] sm:$0xff]  ;;  %v176_v17 = vld [vmem:[%s762_s24 + $0x60] sm:$0xff]  ;;  %v207_v18 = vsel %vm151_vm0, %v185_v9, 0.0  ;;  %v165_v21 = vld [vmem:[%s762_s24 + $0x8] sm:$0xff]  ;;  %p627_p3 = por %p626_p2, %p625_p1 }
  0x1d   : > { %v182_v19 = vld [vmem:[%s762_s24 + $0x90] sm:$0xff]  ;;  %v188_v20 = vadd.f32 %v170_v16, %v164_v15  ;;  %v171_v24 = vld [vmem:[%s762_s24 + $0x38] sm:$0xff]  ;;  %v177_v25 = vld [vmem:[%s762_s24 + $0x68] sm:$0xff]  ;;  %v192_v27 = vsel %vm151_vm0, %v165_v21, 0.0  ;;  %p623_p0 = pneg %p622_p13 }
  0x1e   : > { %v781_v22 = vadd.f32 %v200_v12, %v184_v7  ;;  %v206_v23 = vadd.f32 %v205_v14, %v204_v13  ;;  %v183_v26 = vld [vmem:[%s762_s24 + $0x98] sm:$0xff]  ;;  %v193_v30 = vsel %vm151_vm0, %v171_v24, 0.0  ;;  %v195_v31 = vsel %vm151_vm0, %v177_v25, 0.0  ;;  %v169_v34 = vld [vmem:[%s762_s24 + $0x28] sm:$0x3] }
  0x1f   : > { %v161_v28 = vld [vmem:[#allocation2 + $0x18] sm:$0xff]  ;;  %v189_v29 = vadd.f32 %v188_v20, %v176_v17  ;;  %v194_v33 = vadd.f32 %v193_v30, %v192_v27  ;;  %v181_v36 = vld [vmem:[%s762_s24 + $0x88] sm:$0x3]  ;;  %v197_v38 = vsel %vm151_vm0, %v183_v26, 0.0  ;;  %v218_v40 = vsel %vm156_vm1, %v169_v34, 0.0  ;;  %p628_p5 = pnand %p627_p3, %p623_p0 }
  0x20   : > { %v208_v32 = vadd.f32 %v207_v18, %v206_v23  ;;  %v175_v35 = vld [vmem:[%s762_s24 + $0x58] sm:$0x3]  ;;  %281 = vrot.lane.b32.xlu0 %v781_v22, %s685_s25  ;;  %v168_v44 = vld [vmem:[%s762_s24 + $0x20] sm:$0x3]  ;;  %v159_v45 = vld [vmem:[#allocation2 + $0x8] sm:$0xff]  ;;  %v221_v47 = vsel %vm156_vm1, %v181_v36, 0.0 }
  0x21   : > { %v792_v37 = vadd.f32 %v189_v29, %v182_v19  ;;  %v187_v39 = vld [vmem:[%s762_s24 + $0xb8] sm:$0x3]  ;;  %v219_v41 = vsel %vm156_vm1, %v175_v35, 0.0  ;;  %v196_v43 = vadd.f32 %v195_v31, %v194_v33  ;;  %v174_v48 = vld [vmem:[%s762_s24 + $0x50] sm:$0x3]  ;;  %v210_v52 = vsel %vm209_vm2, %v168_v44, 0.0 }
  0x22   : > { %v228_v42 = vadd.f32 %v208_v32, %v161_v28  ;;  %v220_v46 = vadd.f32 %v219_v41, %v218_v40  ;;  %v223_v50 = vsel %vm156_vm1, %v187_v39, 0.0  ;;  %v180_v51 = vld [vmem:[%s762_s24 + $0x80] sm:$0x3]  ;;  %v186_v54 = vld [vmem:[%s762_s24 + $0xb0] sm:$0x3]  ;;  %v211_v58 = vsel %vm209_vm2, %v174_v48, 0.0 }
  0x23   : > { %v198_v49 = vadd.f32 %v197_v38, %v196_v43  ;;  %277 = vrot.lane.b32.xlu2 %v792_v37, %s685_s25  ;;  %v811_v55 = vmul.f32 -2.0, %v792_v37  ;;  %v163_v57 = vld [vmem:[#allocation2 + $0x28] sm:$0x3]  ;;  %v213_v59 = vsel %vm209_vm2, %v180_v51, 0.0  ;;  %v212_v61 = vadd.f32 %v211_v58, %v210_v52  ;;  %v162_v1 = vld [vmem:[#allocation2 + $0x20] sm:$0x3] }
  0x24   : > { %234 = vst.msk [vmem:[#allocation2 + $0x18] sm:$0xff] %vm151_vm0, %v228_v42  ;;  %v222_v53 = vadd.f32 %v221_v47, %v220_v46  ;;  %v215_v62 = vsel %vm209_vm2, %v186_v54, 0.0  ;;  %v825_v6 = vmul.f32 -2.0, %v781_v22  ;;  %v832_v8 = vmul.f32 -1.0, %v792_v37 }
  0x25   : > { %v226_v56 = vadd.f32 %v198_v49, %v159_v45  ;;  %v214_v0 = vadd.f32 %v213_v59, %v212_v61  ;;  %v324_v10 = vmul.f32 2.0, %v792_v37  ;;  %v326_v11 = vmul.f32 2.0, %v781_v22 }
  0x26   : > { %v224_v60 = vadd.f32 %v223_v50, %v222_v53  ;;  %v837_v12 = vmul.f32 -1.0, %v781_v22  ;;  %v373_v41 = vrot.slane %v792_v37, 2  ;;  %v374_v44 = vrot.slane %v781_v22, 2 }
  0x27   : > { %232 = vst.msk [vmem:[#allocation2 + $0x8] sm:$0xff] %vm151_vm0, %v226_v56  ;;  %v216_v3 = vadd.f32 %v215_v62, %v214_v0  ;;  %v336_v13 = vrot.slane %v324_v10, 1  ;;  %v337_v14 = vrot.slane %v326_v11, 1  ;;  %v383_v33 = vrot.slane %v326_v11, 2 }
  0x28   : > { %v230_v63 = vadd.f32 %v224_v60, %v163_v57  ;;  %258 = vrot.lane.b32.xlu0 %v811_v55, %s686_s26  ;;  %v382_v36 = vrot.slane %v324_v10, 2  ;;  %v375_v46 = vsel %vm362_vm4, %v373_v41, %v374_v44  ;;  %v315_v51 = vrot.slane %v811_v55, 1 }
  0x29   : > { %v229_v4 = vadd.f32 %v216_v3, %v162_v1  ;;  %v338_v18 = vsel %vm314_vm3, %v336_v13, %v337_v14  ;;  %v316_v52 = vrot.slane %v825_v6, 1 }
  0x2a   : > { %236 = vst.msk [vmem:[#allocation2 + $0x28] sm:$0x3] %vm156_vm1, %v230_v63  ;;  %v384_v40 = vsel %vm362_vm4, %v382_v36, %v383_v33 }
  0x2b   : > { %v819_v2 = vld [vmem:[#allocation2 + $0x18] sm:$0xff]  ;;  %235 = vst [vmem:[#allocation2 + $0x20] sm:$0x3] %v229_v4  ;;  %v317_v53 = vsel %vm314_vm3, %v315_v51, %v316_v52 }
  0x2c   : > { %283 = vrot.lane.b32.xlu1 %v819_v2, %s685_s25  ;;  %v293_v16 = vmul.f32 -1.0, %v819_v2  ;;  %v327_v19 = vmul.f32 2.0, %v819_v2  ;;  %v253_v23 = vmul.f32 -2.0, %v819_v2  ;;  %v408_v43 = vrot.slane %v819_v2, 2 }
  0x2e   : > { %v241_v5 = vld [vmem:[#allocation2 + $0x8] sm:$0xff]  ;;  %v340_v26 = vrot.slane %v327_v19, 1  ;;  %v386_v35 = vrot.slane %v327_v19, 2  ;;  %v363_v19 = vrot.slane %v832_v8, 2 }
  0x2f   : > { %v251_v7 = vmul.f32 -2.0, %v241_v5  ;;  %279 = vrot.lane.b32.xlu2 %v241_v5, %s685_s25  ;;  %v292_v9 = vmul.f32 -1.0, %v241_v5  ;;  %v325_v24 = vmul.f32 2.0, %v241_v5  ;;  %v407_v42 = vrot.slane %v241_v5, 2 }
  0x31   : > { %260 = vrot.lane.b32.xlu0 %v251_v7, %s686_s26  ;;  %v245_v15 = vld [vmem:[#allocation2 + $0x28] sm:$0x3]  ;;  %v339_v28 = vrot.slane %v325_v24, 1  ;;  %v385_v32 = vrot.slane %v325_v24, 2  ;;  %v409_v47 = vsel %vm362_vm4, %v407_v42, %v408_v43 }
  0x32   : > { %v845_v17 = vld [vmem:[#allocation2 + $0x20] sm:$0x3]  ;;  %v329_v20 = vmul.f32 2.0, %v245_v15  ;;  %v410_v49 = vrot.slane %v245_v15, 2 }
  0x33   : > { %v328_v21 = vmul.f32 2.0, %v845_v17  ;;  %v341_v31 = vsel %vm314_vm3, %v339_v28, %v340_v26  ;;  %v387_v38 = vsel %vm362_vm4, %v385_v32, %v386_v35  ;;  %v376_v37 = vrot.slane %v845_v17, 2 }
  0x34   : > { %262 = vrot.lane.b32.xlu1 %v825_v6, %s686_s26  ;;  %v344_v27 = vrot.slane %v329_v20, 1  ;;  %v390_v45 = vrot.slane %v329_v20, 2  ;;  %v411_v22 = vsel %vm362_vm4, %v408_v43, %v410_v49 }
  0x35   : > { %v342_v25 = vrot.slane %v328_v21, 1  ;;  %v388_v34 = vrot.slane %v328_v21, 2  ;;  %v879_v50 = vsel %vm362_vm4, %v374_v44, %v376_v37 }
  0x36   : > { %v345_v30 = vsel %vm314_vm3, %v340_v26, %v344_v27  ;;  %v391_v48 = vsel %vm362_vm4, %v386_v35, %v390_v45 }
  0x37   : > { %298 = vrot.lane.b32.xlu2 %v832_v8, %s685_s25  ;;  %v343_v29 = vsel %vm314_vm3, %v337_v14, %v342_v25  ;;  %v389_v39 = vsel %vm362_vm4, %v383_v33, %v388_v34  ;;  %v312_v14 = vmul.f32 -2.0, %v845_v17 }
  0x39   : > { %300 = vrot.lane.b32.xlu0 %v292_v9, %s685_s25  ;;  %v318_v25 = vrot.slane %v312_v14, 1 }
  0x3c   : > { %302 = vrot.lane.b32.xlu1 %v837_v12, %s685_s25 }
  0x3f   : > { %304 = vrot.lane.b32.xlu2 %v293_v16, %s685_s25 }
  0x41   : > { %346 = vrot.lane.b32.xlu0 %v338_v18, %s685_s25  ;;  %v364_v18 = vrot.slane %v837_v12, 2 }
  0x44   : > { %264 = vrot.lane.b32.xlu1 %v253_v23, %s686_s26 }
  0x47   : > { %350 = vrot.lane.b32.xlu2 %v343_v29, %s685_s25  ;;  %v365_v29 = vsel %vm362_vm4, %v363_v19, %v364_v18 }
  0x49   : > { %352 = vrot.lane.b32.xlu0 %v345_v30, %s685_s25 }
  0x4c   : > { %348 = vrot.lane.b32.xlu1 %v341_v31, %s685_s25 }
  0x4f   : > { %394 = vrot.lane.b32.xlu2 %v387_v38, %s686_s26  ;;  %v319_v38 = vsel %vm314_vm3, %v316_v52, %v318_v25 }
  0x51   : > { %396 = vrot.lane.b32.xlu0 %v389_v39, %s686_s26 }
  0x54   : > { %392 = vrot.lane.b32.xlu1 %v384_v40, %s686_s26 }
  0x57   : > { %412 = vrot.lane.b32.xlu2 %v375_v46, %s685_s25 }
  0x59   : > { %414 = vrot.lane.b32.xlu0 %v409_v47, %s685_s25 }
  0x5c   : > { %398 = vrot.lane.b32.xlu1 %v391_v48, %s686_s26 }
  0x5f   : > { %418 = vrot.lane.b32.xlu2 %v411_v22, %s685_s25 }
  0x64   : > { %416 = vrot.lane.b32.xlu1 %v879_v50, %s685_s25 }
  0x7d   : > { %v278_v54 = vpop.permute.xlu2 %277 }
  0x89   : > { %v280_v57 = vpop.permute.xlu2 %279 }
  0x8a   : > { %v286_v6 = vsel %vm285_vm5, %v278_v54, %v280_v57 }
  0x8b   : > { %v290_v10 = vadd.f32 %v286_v6, %v832_v8 }
  0x8d   : > { %v322_v21 = vadd.f32 %v317_v53, %v290_v10 }
  0x91   : > { %v299_v60 = vpop.permute.xlu2 %298 }
  0x92   : > { %v282_v56 = vpop.permute.xlu0 %281 }
  0x99   : > { %v305_v1 = vpop.permute.xlu2 %304 }
  0x9a   : > { %v259_v58 = vpop.permute.xlu0 %258 }
  0x9e   : > { %v284_v59 = vpop.permute.xlu1 %283 }
  0x9f   : > { %v287_v26 = vsel %vm285_vm5, %v282_v56, %v284_v59 }
  0xa0   : > { %v291_v32 = vadd.f32 %v287_v26, %v837_v12 }
  0xa1   : > { %v351_v4 = vpop.permute.xlu2 %350 }
  0xa3   : > { %v261_v61 = vpop.permute.xlu0 %260 }
  0xa4   : > { %v267_v9 = vsel %vm266_vm6, %v259_v58, %v261_v61 }
  0xa5   : > { %v271_v13 = vadd.f32 %v267_v9, %v832_v8  ;;  %v360_v8 = vmul.f32 -1.0, %v845_v17 }
  0xa6   : > { %v263_v62 = vpop.permute.xlu1 %262 }
  0xa7   : > { %v366_v45 = vrot.slane %v360_v8, 2 }
  0xa9   : > { %v395_v7 = vpop.permute.xlu2 %394  ;;  %v367_v48 = vsel %vm362_vm4, %v364_v18, %v366_v45 }
  0xab   : > { %v301_v63 = vpop.permute.xlu0 %300 }
  0xac   : > { %v306_v11 = vsel %vm285_vm5, %v299_v60, %v301_v63 }
  0xad   : > { %v310_v20 = vadd.f32 %v306_v11, %v271_v13 }
  0xae   : > { %v303_v0 = vpop.permute.xlu1 %302 }
  0xaf   : > { %v380_v30 = vadd.f32 %v375_v46, %v310_v20  ;;  %v307_v43 = vsel %vm285_vm5, %v303_v0, %v305_v1  ;;  %v323_v46 = vadd.f32 %v319_v38, %v291_v32 }
  0xb1   : > { %v413_v31 = vpop.permute.xlu2 %412 }
  0xb3   : > { %v347_v2 = vpop.permute.xlu0 %346 }
  0xb6   : > { %v265_v3 = vpop.permute.xlu1 %264 }
  0xb7   : > { %v268_v27 = vsel %vm266_vm6, %v263_v62, %v265_v3 }
  0xb8   : > { %v272_v33 = vadd.f32 %v268_v27, %v837_v12 }
  0xb9   : > { %v419_v37 = vpop.permute.xlu2 %418 }
  0xba   : > { %v311_v17 = vadd.f32 %v307_v43, %v272_v33 }
  0xbb   : > { %v353_v55 = vpop.permute.xlu0 %352 }
  0xbc   : > { %v355_v44 = vsel %vm285_vm5, %v351_v4, %v353_v55  ;;  %v381_v49 = vadd.f32 %v879_v50, %v311_v17 }
  0xbd   : > { %v359_v12 = vadd.f32 %v355_v44, %v323_v46 }
  0xbe   : > { %v349_v5 = vpop.permute.xlu1 %348 }
  0xbf   : > { %v354_v16 = vsel %vm285_vm5, %v347_v2, %v349_v5  ;;  %v371_v52 = vadd.f32 %v367_v48, %v359_v12 }
  0xc0   : > { %v358_v24 = vadd.f32 %v354_v16, %v322_v21 }
  0xc2   : > { %v370_v36 = vadd.f32 %v365_v29, %v358_v24 }
  0xc3   : > { %v397_v15 = vpop.permute.xlu0 %396 }
  0xc6   : > { %v393_v23 = vpop.permute.xlu1 %392 }
  0xc7   : > { %v400_v28 = vsel %vm266_vm6, %v393_v23, %v395_v7 }
  0xc8   : > { %v404_v34 = vadd.f32 %v400_v28, %v380_v30 }
  0xcb   : > { %v415_v35 = vpop.permute.xlu0 %414 }
  0xcc   : > { %v420_v39 = vsel %vm285_vm5, %v413_v31, %v415_v35 }
  0xcd   : > { %v424_v41 = vadd.f32 %v420_v39, %v370_v36  ;;  %v426_v42 = vadd.f32 %v420_v39, %v404_v34 }
  0xce   : > { %v399_v40 = vpop.permute.xlu1 %398 }
  0xcf   : > { %428 = vst [vmem:[%s134_s30] sm:$0xff] %v424_v41  ;;  %v401_v47 = vsel %vm266_vm6, %v397_v15, %v399_v40 }
  0xd0   : > { %535 = vst [vmem:[%s134_s30 + $0x10] sm:$0xff] %v426_v42  ;;  %v405_v22 = vadd.f32 %v401_v47, %v381_v49 }
  0xd6   : > { %v417_v51 = vpop.permute.xlu1 %416 }
  0xd7   : > { %v421_v53 = vsel %vm285_vm5, %v417_v51, %v419_v37 }
  0xd8   : > { %v425_v54 = vadd.f32 %v421_v53, %v371_v52  ;;  %v427_v56 = vadd.f32 %v421_v53, %v405_v22 }
  0xda   : > { %429 = vst [vmem:[%s134_s30 + $0x8] sm:$0xff] %v425_v54 }
  0xdb   : > { %536 = vst [vmem:[%s134_s30 + $0x18] sm:$0xff] %v427_v56 }
  0xdc   : > { %631 = shalt.err (!%p628_p5)
}
  0xdd   : > { %s687_s24 = smov 128   ;;  %s688_s25 = smov 8  }
  0xde   : > { %544 = dma.vmem_to_hbm [thread:$0]  (%p739_p4), %s447_s5, 512, %s449_s9, %s434_s12, %s687_s24, %s687_s24, %s688_s25  }
  0xdf PF: > { %p550_p6 = scmp.ge.s32.totalorder %s682_s11, 2  ;;  %s463_s26 = sand.u32 1, %s662_s6  }
  0xe0   : > { %s464_s27 = scalar_lea.sflag [#allocation4], %s463_s26 }
  0xe1   : > { %p547_p7 = pnand %p550_p6, %p746_p8 }
  0xe3   : > { %p548_p9 = pneg %p547_p7 }
  0xe5   : > { %657 = dma.done.wait (%p548_p9), %s464_s27, 512  }
  0xe6   : > { %659 = vsyncadd (%p548_p9), %s464_s27, 4294966784  ;;  %s14_s11 = sadd.s32 1, %s682_s11   ;;  %s955_s6 = smov %s666_s7 }
  0xe7   : > { %p11_p10 = scmp.ge.s32.totalorder %s14_s11, 4   ;;  %s956_s7 = smov %s670_s8 }
  0xe8   : > { %s957_s8 = smov %s752_s19  ;;  %s958_s9 = smov %s678_s10 }
  0xe9   : > { %s959_s10 = smov %s961_s14  ;;  %13 = sbr.rel (!%p11_p10) target bundleno = 4 (0x4), region = 68 }
  0xee   :  { %470 = vsyncpa [#allocation4], 1 }
  0xef   :  { %472 = vsyncpa [#allocation4 + $0x1], 1 }

</bundles_post_ra>
